<compile_context>
chip_gen: v5e
topology: v5e:2x2
jax: 0.10.0
libtpu: 0.0.40
codegen_flags: <defaults>
</compile_context>

<pallas_src>
import jax
import jax.numpy as jnp
from jax.experimental import pallas as pl
from jax.experimental.pallas import tpu as pltpu


def _round_up(x, m):
    return (x + m - 1) // m * m


def gcn_kernel(a_ref, x_ref, w_ref, b_ref, o_ref, acc_ref):
    """One (row-tile i, source-tile k) grid step.

    acc_ref accumulates agg = A_hat @ X for the current row tile in f32.
    On the last k step the epilogue does out = agg @ W + b (aggregate-then-
    transform ordering, cheaper since Din < Dout) and stores a lane-dense tile.
    """
    k = pl.program_id(1)

    @pl.when(k == 0)
    def _():
        acc_ref[...] = jnp.zeros_like(acc_ref)

    # [tm, tk] (bf16) @ [tk, Din] (bf16) -> f32 accumulate on the MXU.
    acc_ref[...] += jnp.dot(a_ref[...], x_ref[...],
                            preferred_element_type=jnp.float32)

    @pl.when(k == pl.num_programs(1) - 1)
    def _():
        # Epilogue: [tm, Din] @ [Din, Dout] + bias, once per row tile.
        out = jnp.dot(acc_ref[...].astype(w_ref.dtype), w_ref[...],
                      preferred_element_type=jnp.float32)
        o_ref[...] = (out + b_ref[...]).astype(o_ref.dtype)


def gcn_forward(encodings, a_hat, weight, bias, *, tm=256, tk=512,
                vmem_limit_bytes=32 * 1024 * 1024):
    """out = A_hat @ encodings @ weight + bias, via a tiled Pallas kernel.

    tm, tk must be powers of two that are multiples of 128 (defaults 256/512).
    """
    N, Din = encodings.shape
    Dout = weight.shape[1]

    # Pad node count and output features to multiples of 128 so MXU passes are
    # full-width and output stores are lane-dense (unmasked vst).
    N_pad = _round_up(max(N, 128), 128)
    Dout_pad = _round_up(max(Dout, 128), 128)

    tm = min(tm, N_pad)
    tk = min(tk, N_pad)
    # Make sure the tiles divide the padded node dimension exactly.
    N_pad = _round_up(N_pad, max(tm, tk))

    # bf16 operands for the MXU (accumulation stays f32 inside the kernel).
    a_p = jnp.zeros((N_pad, N_pad), jnp.bfloat16).at[:N, :N].set(
        a_hat.astype(jnp.bfloat16))
    x_p = jnp.zeros((N_pad, Din), jnp.bfloat16).at[:N, :].set(
        encodings.astype(jnp.bfloat16))
    w_p = jnp.zeros((Din, Dout_pad), jnp.bfloat16).at[:, :Dout].set(
        weight.astype(jnp.bfloat16))
    b_p = jnp.zeros((1, Dout_pad), jnp.float32).at[0, :Dout].set(
        bias.astype(jnp.float32))

    grid = (N_pad // tm, N_pad // tk)   # (row tiles: parallel, K-reduction: arbitrary)

    cost = pl.CostEstimate(
        flops=2 * N_pad * N_pad * Din + 2 * N_pad * Din * Dout_pad,
        transcendentals=0,
        bytes_accessed=(a_p.size * 2 + x_p.size * 2 + w_p.size * 2
                        + b_p.size * 4 + N_pad * Dout_pad * 4),
    )

    out = pl.pallas_call(
        gcn_kernel,
        out_shape=jax.ShapeDtypeStruct((N_pad, Dout_pad), jnp.float32),
        grid_spec=pltpu.PrefetchScalarGridSpec(
            num_scalar_prefetch=0,
            grid=grid,
            in_specs=[
                pl.BlockSpec((tm, tk), lambda i, k: (i, k)),         # A_hat tile
                pl.BlockSpec((tk, Din), lambda i, k: (k, 0)),        # X tile
                pl.BlockSpec((Din, Dout_pad), lambda i, k: (0, 0)),  # W (resident)
                pl.BlockSpec((1, Dout_pad), lambda i, k: (0, 0)),    # bias (resident)
            ],
            out_specs=pl.BlockSpec((tm, Dout_pad), lambda i, k: (i, 0)),
            scratch_shapes=[pltpu.VMEM((tm, Din), jnp.float32)],     # agg accumulator
        ),
        compiler_params=pltpu.CompilerParams(
            dimension_semantics=("parallel", "arbitrary"),
            vmem_limit_bytes=vmem_limit_bytes,
        ),
        cost_estimate=cost,
    )(a_p, x_p, w_p, b_p)

    return out[:N, :Dout]


def build_normalized_adjacency(edge_index, num_nodes):
    """Dense D^{-1/2}(A+I)D^{-1/2} from a [2, E] int edge_index (PyG gcn_norm)."""
    loop = jnp.arange(num_nodes, dtype=edge_index.dtype)
    row = jnp.concatenate([edge_index[0], loop])   # sources j
    col = jnp.concatenate([edge_index[1], loop])   # targets i
    ew = jnp.ones(row.shape[0], dtype=jnp.float32)
    deg = jnp.zeros((num_nodes,), jnp.float32).at[col].add(ew)
    deg_inv_sqrt = jnp.where(deg > 0, jax.lax.rsqrt(deg), 0.0)
    norm = deg_inv_sqrt[row] * ew * deg_inv_sqrt[col]
    # A_hat[target, source] so that (A_hat @ XW)[i] = sum_j norm_ij * (XW)[j]
    a_hat = jnp.zeros((num_nodes, num_nodes), jnp.float32).at[col, row].add(norm)
    return a_hat


if __name__ == "__main__":
    key = jax.random.PRNGKey(0)
    k_x, k_w, k_e1, k_e2, k_x2 = jax.random.split(key, 5)

    # ---- Small demo consistent with the module: encoding_dim -> embedding_dim.
    num_nodes = 16
    encoding_dim = 32
    embedding_dim = 128

    encodings = jax.random.normal(k_x, (num_nodes, encoding_dim), jnp.float32)

    # "subnetwork": sparse edge_index [2, E] — a bidirectional ring.
    src = jnp.arange(num_nodes, dtype=jnp.int32)
    dst = (src + 1) % num_nodes
    edge_index = jnp.stack(
        [jnp.concatenate([src, dst]), jnp.concatenate([dst, src])], axis=0)

    # Deterministic GCNConv parameters (glorot-like weight, zero bias as in PyG).
    limit = jnp.sqrt(6.0 / (encoding_dim + embedding_dim))
    weight = jax.random.uniform(
        k_w, (encoding_dim, embedding_dim), jnp.float32, -limit, limit)
    bias = jnp.zeros((embedding_dim,), jnp.float32)

    a_hat = build_normalized_adjacency(edge_index, num_nodes)

    out = gcn_forward(encodings, a_hat, weight, bias)
    out = jax.block_until_ready(out)

    ref = a_hat @ (encodings @ weight) + bias[None, :]
    assert out.shape == (num_nodes, embedding_dim)
    assert jnp.allclose(out, ref, atol=2e-2, rtol=2e-2)

    # ---- Larger graph to exercise the multi-tile grid + K-reduction path.
    n2 = 600
    enc2 = jax.random.normal(k_x2, (n2, encoding_dim), jnp.float32)
    e_src = jax.random.randint(k_e1, (3000,), 0, n2, dtype=jnp.int32)
    e_dst = jax.random.randint(k_e2, (3000,), 0, n2, dtype=jnp.int32)
    ei2 = jnp.stack([jnp.concatenate([e_src, e_dst]),
                     jnp.concatenate([e_dst, e_src])], axis=0)
    a_hat2 = build_normalized_adjacency(ei2, n2)

    out2 = gcn_forward(enc2, a_hat2, weight, bias)
    out2 = jax.block_until_ready(out2)

    ref2 = a_hat2 @ (enc2 @ weight) + bias[None, :]
    assert out2.shape == (n2, embedding_dim)
    assert jnp.allclose(out2, ref2, atol=2e-2, rtol=2e-2)

    print("KERNEL_OK")
</pallas_src>

<mosaic_0001>
module attributes {stable_mosaic.version = 11 : i64} {
  func.func @gcn_kernel(%arg0: i32, %arg1: i32, %arg2: memref<128x128xbf16, #tpu.memory_space<vmem>>, %arg3: memref<128x32xbf16, #tpu.memory_space<vmem>>, %arg4: memref<32x128xbf16, #tpu.memory_space<vmem>>, %arg5: memref<1x128xf32, #tpu.memory_space<vmem>>, %arg6: memref<128x128xf32, #tpu.memory_space<vmem>>, %arg7: memref<128x32xf32, #tpu.memory_space<vmem>>) attributes {dimension_semantics = [#tpu.dimension_semantics<parallel>, #tpu.dimension_semantics<arbitrary>], iteration_bounds = array<i64: 1, 1>, scalar_prefetch = 0 : i64, scratch_operands = 1 : i64, tpu.core_type = #tpu.core_type<tc>, window_params = [{transform_indices = @transform_0, window_bounds = array<i64: 128, 128>}, {transform_indices = @transform_1, window_bounds = array<i64: 128, 32>}, {pipeline_mode = #tpu.pipeline_mode<synchronous>, transform_indices = @transform_2, window_bounds = array<i64: 32, 128>}, {pipeline_mode = #tpu.pipeline_mode<synchronous>, transform_indices = @transform_3, window_bounds = array<i64: 1, 128>}, {transform_indices = @transform_4, window_bounds = array<i64: 128, 128>}]} {
    %c0_i32 = arith.constant 0 : i32
    %0 = arith.cmpi eq, %arg1, %c0_i32 : i32
    %1 = arith.extui %0 : i1 to i32
    %c0_i32_0 = arith.constant 0 : i32
    %2 = arith.cmpi ne, %1, %c0_i32_0 : i32
    scf.if %2 {
      %cst_10 = arith.constant 0.000000e+00 : f32
      %12 = vector.broadcast %cst_10 : f32 to vector<128x32xf32>
      %c0_11 = arith.constant 0 : index
      %c0_12 = arith.constant 0 : index
      %13 = vector.load %arg7[%c0_11, %c0_12] : memref<128x32xf32, #tpu.memory_space<vmem>>, vector<128x32xf32>
      tpu.vector_store %arg7[%c0_11, %c0_12], %12 {strides = array<i32>} : memref<128x32xf32, #tpu.memory_space<vmem>>, vector<128x32xf32>,
    } else {
    }
    %c0 = arith.constant 0 : index
    %c0_1 = arith.constant 0 : index
    %3 = vector.load %arg7[%c0, %c0_1] : memref<128x32xf32, #tpu.memory_space<vmem>>, vector<128x32xf32>
    %c0_2 = arith.constant 0 : index
    %c0_3 = arith.constant 0 : index
    %4 = vector.load %arg2[%c0_2, %c0_3] : memref<128x128xbf16, #tpu.memory_space<vmem>>, vector<128x128xbf16>
    %c0_4 = arith.constant 0 : index
    %c0_5 = arith.constant 0 : index
    %5 = vector.load %arg3[%c0_4, %c0_5] : memref<128x32xbf16, #tpu.memory_space<vmem>>, vector<128x32xbf16>
    %cst = arith.constant dense<0.000000e+00> : vector<128x32xf32>
    %6 = tpu.matmul %4, %5, %cst {dimension_numbers = #tpu.dot_dimension_numbers<[1], [0], [0], [1], [0, 0, 1, 1], [], []>} : vector<128x128xbf16>, vector<128x32xbf16>, vector<128x32xf32> -> vector<128x32xf32>
    %7 = arith.addf %3, %6 : vector<128x32xf32>
    %c0_6 = arith.constant 0 : index
    %c0_7 = arith.constant 0 : index
    %8 = vector.load %arg7[%c0_6, %c0_7] : memref<128x32xf32, #tpu.memory_space<vmem>>, vector<128x32xf32>
    tpu.vector_store %arg7[%c0_6, %c0_7], %7 {strides = array<i32>} : memref<128x32xf32, #tpu.memory_space<vmem>>, vector<128x32xf32>,
    %c0_i32_8 = arith.constant 0 : i32
    %9 = arith.cmpi eq, %arg1, %c0_i32_8 : i32
    %10 = arith.extui %9 : i1 to i32
    %c0_i32_9 = arith.constant 0 : i32
    %11 = arith.cmpi ne, %10, %c0_i32_9 : i32
    scf.if %11 {
      %c0_10 = arith.constant 0 : index
      %c0_11 = arith.constant 0 : index
      %12 = vector.load %arg7[%c0_10, %c0_11] : memref<128x32xf32, #tpu.memory_space<vmem>>, vector<128x32xf32>
      %13 = arith.truncf %12 : vector<128x32xf32> to vector<128x32xbf16>
      %c0_12 = arith.constant 0 : index
      %c0_13 = arith.constant 0 : index
      %14 = vector.load %arg4[%c0_12, %c0_13] : memref<32x128xbf16, #tpu.memory_space<vmem>>, vector<32x128xbf16>
      %cst_14 = arith.constant dense<0.000000e+00> : vector<128x128xf32>
      %15 = tpu.matmul %13, %14, %cst_14 {dimension_numbers = #tpu.dot_dimension_numbers<[1], [0], [0], [1], [0, 0, 1, 1], [], []>} : vector<128x32xbf16>, vector<32x128xbf16>, vector<128x128xf32> -> vector<128x128xf32>
      %c0_15 = arith.constant 0 : index
      %c0_16 = arith.constant 0 : index
      %16 = vector.load %arg5[%c0_15, %c0_16] : memref<1x128xf32, #tpu.memory_space<vmem>>, vector<1x128xf32>
      %17 = vector.broadcast %16 : vector<1x128xf32> to vector<128x128xf32>
      %18 = arith.addf %15, %17 : vector<128x128xf32>
      %c0_17 = arith.constant 0 : index
      %c0_18 = arith.constant 0 : index
      %19 = vector.load %arg6[%c0_17, %c0_18] : memref<128x128xf32, #tpu.memory_space<vmem>>, vector<128x128xf32>
      tpu.vector_store %arg6[%c0_17, %c0_18], %18 {strides = array<i32>} : memref<128x128xf32, #tpu.memory_space<vmem>>, vector<128x128xf32>,
    } else {
    }
    return
  }
  func.func @transform_0(%arg0: i32, %arg1: i32) -> (i32, i32) {
    %c0_i32 = arith.constant 0 : i32
    return %arg0, %arg1 : i32, i32
  }
  func.func @transform_1(%arg0: i32, %arg1: i32) -> (i32, i32) {
    %c0_i32 = arith.constant 0 : i32
    %c0_i32_0 = arith.constant 0 : i32
    return %arg1, %c0_i32 : i32, i32
  }
  func.func @transform_2(%arg0: i32, %arg1: i32) -> (i32, i32) {
    %c0_i32 = arith.constant 0 : i32
    %c0_i32_0 = arith.constant 0 : i32
    %c0_i32_1 = arith.constant 0 : i32
    return %c0_i32, %c0_i32_0 : i32, i32
  }
  func.func @transform_3(%arg0: i32, %arg1: i32) -> (i32, i32) {
    %c0_i32 = arith.constant 0 : i32
    %c0_i32_0 = arith.constant 0 : i32
    %c0_i32_1 = arith.constant 0 : i32
    return %c0_i32, %c0_i32_0 : i32, i32
  }
  func.func @transform_4(%arg0: i32, %arg1: i32) -> (i32, i32) {
    %c0_i32 = arith.constant 0 : i32
    %c0_i32_0 = arith.constant 0 : i32
    return %arg0, %c0_i32 : i32, i32
  }
}

</mosaic_0001>

<bundles_post_ra>
// kernel: tpu_custom_call.1
= control target key start
LH: loop header
LB: loop body
LE: loop exit
PB: predicated region body
PF: predicated region fallthrough
CT: control target
= control target key end

     0   :  { %s688_s0 = inlined_call_operand.vmem [shape: bf16[128,128], index: 0, kind: input, shape index: {}]   ;;  %s689_s1 = inlined_call_operand.vmem [shape: bf16[128,32], index: 1, kind: input, shape index: {}]   ;;  %s690_s2 = inlined_call_operand.vmem [shape: bf16[32,128], index: 2, kind: input, shape index: {}]   ;;  %s691_s3 = inlined_call_operand.vmem [shape: f32[1,128], index: 3, kind: input, shape index: {}]   ;;  %s692_s4 = inlined_call_operand.hbm [shape: f32[128,128], index: 4, kind: output, shape index: {}]  }
   0x1   :  { %v515_v0 = vld [vmem:[%s689_s1 + $0x38] sm:$0xff]  ;;  %v514_v1 = vld [vmem:[%s689_s1 + $0x30] sm:$0xff] }
   0x2   :  { %184 = vmatpush.bf16.msra.mxu0 %v515_v0  ;;  %518 = vmatpush.bf16.msra.mxu2 %v515_v0 }
   0x3   :  { %9 = vsyncpa [#allocation4], 0  ;;  %v513_v2 = vld [vmem:[%s689_s1 + $0x28] sm:$0xff]  ;;  %v512_v3 = vld [vmem:[%s689_s1 + $0x20] sm:$0xff]  ;;  %vm23_vm0 = vcmask 261120   ;;  %v559_v12 = vmov 0.0  }
   0x4   :  { %v511_v4 = vld [vmem:[%s689_s1 + $0x18] sm:$0xff]  ;;  %v510_v5 = vld [vmem:[%s689_s1 + $0x10] sm:$0xff]  ;;  %v509_v6 = vld [vmem:[%s689_s1 + $0x8] sm:$0xff]  ;;  %24 = vst.msk [vmem:[#allocation2] sm:$0xff] %vm23_vm0, %v559_v12  ;;  %s408_s27 = sshll.u32 %s692_s4, 4  ;;  %s561_s28 = smov 128   ;;  %s409_s27 = int_to_ptr.hbm [resolvable:$true] %s408_s27 }
   0x5   :  { %v508_v7 = vld [vmem:[%s689_s1] sm:$0xff]  ;;  %v501_v10 = vld [vmem:[%s688_s0 + $0x8] sm:$0xff]  ;;  %25 = vst.msk [vmem:[#allocation2 + $0x8] sm:$0xff] %vm23_vm0, %v559_v12  ;;  %v502_v13 = vld [vmem:[%s688_s0 + $0x10] sm:$0xff]  ;;  %s562_s29 = smov 8  }
   0x6   :  { %185 = vmatpush.bf16.msra.mxu0 %v514_v1  ;;  %519 = vmatpush.bf16.msra.mxu2 %v514_v1  ;;  %v500_v8 = vld [vmem:[%s688_s0] sm:$0xff]  ;;  %v505_v11 = vld [vmem:[%s688_s0 + $0x28] sm:$0xff]  ;;  %26 = vst.msk [vmem:[#allocation2 + $0x10] sm:$0xff] %vm23_vm0, %v559_v12  ;;  %v506_v14 = vld [vmem:[%s688_s0 + $0x30] sm:$0xff] }
   0x7   :  { %v504_v9 = vld [vmem:[%s688_s0 + $0x20] sm:$0xff]  ;;  %27 = vst.msk [vmem:[#allocation2 + $0x18] sm:$0xff] %vm23_vm0, %v559_v12  ;;  %v503_v15 = vld [vmem:[%s688_s0 + $0x18] sm:$0xff]  ;;  %v517_v17 = vld [vmem:[%s690_s2 + $0x8] sm:$0xff] }
   0x8   :  { %28 = vst.msk [vmem:[#allocation2 + $0x20] sm:$0xff] %vm23_vm0, %v559_v12  ;;  %v507_v16 = vld [vmem:[%s688_s0 + $0x38] sm:$0xff]  ;;  %343 = vmatpush.bf16.msra.mxu1 %v517_v17  ;;  %526 = vmatpush.bf16.msra.mxu3 %v517_v17  ;;  %v516_v18 = vld [vmem:[%s690_s2] sm:$0xff] }
   0x9   :  { %29 = vst.msk [vmem:[#allocation2 + $0x28] sm:$0xff] %vm23_vm0, %v559_v12 }
   0xa   :  { %186 = vmatpush.bf16.msra.mxu0 %v513_v2  ;;  %520 = vmatpush.bf16.msra.mxu2 %v513_v2  ;;  %30 = vst.msk [vmem:[#allocation2 + $0x30] sm:$0xff] %vm23_vm0, %v559_v12 }
   0xb   :  { %31 = vst.msk [vmem:[#allocation2 + $0x38] sm:$0xff] %vm23_vm0, %v559_v12  ;;  %v40_v19 = vld [vmem:[#allocation2] sm:$0xff] }
   0xc   :  { %32 = vst.msk [vmem:[#allocation2 + $0x40] sm:$0xff] %vm23_vm0, %v559_v12  ;;  %344 = vmatpush.bf16.msra.mxu1 %v516_v18  ;;  %527 = vmatpush.bf16.msra.mxu3 %v516_v18  ;;  %v41_v24 = vld [vmem:[#allocation2 + $0x8] sm:$0xff] }
   0xd   :  { %33 = vst.msk [vmem:[#allocation2 + $0x48] sm:$0xff] %vm23_vm0, %v559_v12  ;;  %v42_v30 = vld [vmem:[#allocation2 + $0x10] sm:$0xff] }
   0xe   :  { %187 = vmatpush.bf16.msra.mxu0 %v512_v3  ;;  %521 = vmatpush.bf16.msra.mxu2 %v512_v3  ;;  %34 = vst.msk [vmem:[#allocation2 + $0x50] sm:$0xff] %vm23_vm0, %v559_v12  ;;  %v43_v39 = vld [vmem:[#allocation2 + $0x18] sm:$0xff] }
   0xf   :  { %35 = vst.msk [vmem:[#allocation2 + $0x58] sm:$0xff] %vm23_vm0, %v559_v12  ;;  %v44_v45 = vld [vmem:[#allocation2 + $0x20] sm:$0xff] }
  0x10   :  { %36 = vst.msk [vmem:[#allocation2 + $0x60] sm:$0xff] %vm23_vm0, %v559_v12  ;;  %v45_v54 = vld [vmem:[#allocation2 + $0x28] sm:$0xff] }
  0x11   :  { %37 = vst.msk [vmem:[#allocation2 + $0x68] sm:$0xff] %vm23_vm0, %v559_v12  ;;  %v46_v63 = vld [vmem:[#allocation2 + $0x30] sm:$0xff] }
  0x12   :  { %188 = vmatpush.bf16.msra.mxu0 %v511_v4  ;;  %522 = vmatpush.bf16.msra.mxu2 %v511_v4  ;;  %38 = vst.msk [vmem:[#allocation2 + $0x70] sm:$0xff] %vm23_vm0, %v559_v12 }
  0x13   :  { %39 = vst.msk [vmem:[#allocation2 + $0x78] sm:$0xff] %vm23_vm0, %v559_v12  ;;  %v48_v22 = vld [vmem:[#allocation2 + $0x40] sm:$0xff] }
  0x14   :  { %v49_v28 = vld [vmem:[#allocation2 + $0x48] sm:$0xff] }
  0x15   :  { %v50_v37 = vld [vmem:[#allocation2 + $0x50] sm:$0xff] }
  0x16   :  { %189 = vmatpush.bf16.msra.mxu0 %v510_v5  ;;  %523 = vmatpush.bf16.msra.mxu2 %v510_v5  ;;  %v51_v43 = vld [vmem:[#allocation2 + $0x58] sm:$0xff] }
  0x17   :  { %v52_v52 = vld [vmem:[#allocation2 + $0x60] sm:$0xff] }
  0x18   :  { %v53_v61 = vld [vmem:[#allocation2 + $0x68] sm:$0xff] }
  0x1a   :  { %190 = vmatpush.bf16.msra.mxu0 %v509_v6  ;;  %524 = vmatpush.bf16.msra.mxu2 %v509_v6  ;;  %v54_v6 = vld [vmem:[#allocation2 + $0x70] sm:$0xff] }
  0x1e   :  { %191 = vmatpush.bf16.msra.mxu0 %v508_v7  ;;  %525 = vmatpush.bf16.msra.mxu2 %v508_v7 }
  0x21   :  { %192 = vmatmul.bf16.vlgmr.msra.gmra.mxu0 %v500_v8  ;;  %212 = vmatmul.bf16.vlgmr.msra.gmra.mxu2 %v504_v9  ;;  %v47_v8 = vld [vmem:[#allocation2 + $0x38] sm:$0xff] }
  0x31   :  { %197 = vmatmul.bf16.gmra.mxu0 %v501_v10  ;;  %217 = vmatmul.bf16.gmra.mxu2 %v505_v11 }
  0x41   :  { %202 = vmatmul.bf16.gmra.mxu0 %v502_v13  ;;  %222 = vmatmul.bf16.gmra.mxu2 %v506_v14 }
  0x51   :  { %207 = vmatmul.bf16.gmra.mxu0 %v503_v15  ;;  %227 = vmatmul.bf16.gmra.mxu2 %v507_v16  ;;  %v55_v15 = vld [vmem:[#allocation2 + $0x78] sm:$0xff] }
  0x9e   :  { %v193_v20 = vpop.f32.mrf.mxu0 }
  0x9f   :  { %v233_v21 = vadd.f32 %v193_v20, %v40_v19 }
  0xa1   :  { %250 = vst.msk [vmem:[#allocation2] sm:$0xff] %vm23_vm0, %v233_v21 }
  0xa4   :  { %v213_v23 = vpop.f32.mrf.mxu2 }
  0xa5   :  { %v241_v25 = vadd.f32 %v213_v23, %v48_v22 }
  0xa6   :  { %v195_v26 = vpop.f32.mrf.mxu0 }
  0xa7   :  { %258 = vst.msk [vmem:[#allocation2 + $0x40] sm:$0xff] %vm23_vm0, %v241_v25  ;;  %v234_v27 = vadd.f32 %v195_v26, %v41_v24 }
  0xa8   :  { %v269_v34 = vld [vmem:[#allocation2] sm:$0xff] }
  0xa9   :  { %251 = vst.msk [vmem:[#allocation2 + $0x8] sm:$0xff] %vm23_vm0, %v234_v27  ;;  %v532_v27 = vld [vmem:[%s691_s3] ss:$0 sm:$0xff]  ;;  %s560_s3 = smov [#allocation3]  }
  0xaa   :  { %s406_s24 = sshll.u32 %s560_s3, 4  ;;  %s407_s24 = int_to_ptr.vmem [resolvable:$true] %s406_s24 }
  0xac   :  { %v215_v29 = vpop.f32.mrf.mxu2 }
  0xad   :  { %v242_v31 = vadd.f32 %v215_v29, %v49_v28 }
  0xae   :  { %v198_v32 = vpop.f32.mrf.mxu0  ;;  %v277_v25 = vld [vmem:[#allocation2 + $0x40] sm:$0xff] }
  0xaf   :  { %259 = vst.msk [vmem:[#allocation2 + $0x48] sm:$0xff] %vm23_vm0, %v242_v31  ;;  %v235_v33 = vadd.f32 %v198_v32, %v42_v30 }
  0xb0   :  { %v270_v35 = vld [vmem:[#allocation2 + $0x8] sm:$0xff] }
  0xb1   :  { %252 = vst.msk [vmem:[#allocation2 + $0x10] sm:$0xff] %vm23_vm0, %v235_v33  ;;  %v285_v36 = vpack.c.bf16 %v270_v35, %v269_v34 }
  0xb3   :  { %492 = vmatmul.msk.bf16.vlgmr.msra.gmra.mxu1 %vm23_vm0, %v285_v36 }
  0xb4   :  { %v218_v38 = vpop.f32.mrf.mxu2 }
  0xb5   :  { %v243_v40 = vadd.f32 %v218_v38, %v50_v37 }
  0xb6   :  { %v200_v41 = vpop.f32.mrf.mxu0  ;;  %v278_v24 = vld [vmem:[#allocation2 + $0x48] sm:$0xff] }
  0xb7   :  { %260 = vst.msk [vmem:[#allocation2 + $0x50] sm:$0xff] %vm23_vm0, %v243_v40  ;;  %v236_v42 = vadd.f32 %v200_v41, %v43_v39  ;;  %v289_v26 = vpack.c.bf16 %v278_v24, %v277_v25 }
  0xb8   :  { %v271_v49 = vld [vmem:[#allocation2 + $0x10] sm:$0xff] }
  0xb9   :  { %253 = vst.msk [vmem:[#allocation2 + $0x18] sm:$0xff] %vm23_vm0, %v236_v42 }
  0xbc   :  { %v220_v44 = vpop.f32.mrf.mxu2 }
  0xbd   :  { %v244_v46 = vadd.f32 %v220_v44, %v51_v43 }
  0xbe   :  { %v203_v47 = vpop.f32.mrf.mxu0  ;;  %v279_v57 = vld [vmem:[#allocation2 + $0x50] sm:$0xff] }
  0xbf   :  { %261 = vst.msk [vmem:[#allocation2 + $0x58] sm:$0xff] %vm23_vm0, %v244_v46  ;;  %v237_v48 = vadd.f32 %v203_v47, %v44_v45 }
  0xc0   :  { %v272_v50 = vld [vmem:[#allocation2 + $0x18] sm:$0xff] }
  0xc1   :  { %254 = vst.msk [vmem:[#allocation2 + $0x20] sm:$0xff] %vm23_vm0, %v237_v48  ;;  %v286_v51 = vpack.c.bf16 %v272_v50, %v271_v49 }
  0xc3   :  { %493 = vmatmul.msk.bf16.gmra.mxu1 %vm23_vm0, %v286_v51 }
  0xc4   :  { %v223_v53 = vpop.f32.mrf.mxu2 }
  0xc5   :  { %v245_v55 = vadd.f32 %v223_v53, %v52_v52 }
  0xc6   :  { %v205_v56 = vpop.f32.mrf.mxu0  ;;  %v280_v58 = vld [vmem:[#allocation2 + $0x58] sm:$0xff] }
  0xc7   :  { %262 = vst.msk [vmem:[#allocation2 + $0x60] sm:$0xff] %vm23_vm0, %v245_v55  ;;  %v238_v59 = vadd.f32 %v205_v56, %v45_v54  ;;  %v290_v60 = vpack.c.bf16 %v280_v58, %v279_v57 }
  0xc8   :  { %v273_v3 = vld [vmem:[#allocation2 + $0x20] sm:$0xff] }
  0xc9   :  { %255 = vst.msk [vmem:[#allocation2 + $0x28] sm:$0xff] %vm23_vm0, %v238_v59  ;;  %497 = vmatmul.msk.bf16.vlgmr.msra.gmra.mxu3 %vm23_vm0, %v290_v60 }
  0xcc   :  { %v225_v62 = vpop.f32.mrf.mxu2 }
  0xcd   :  { %v246_v0 = vadd.f32 %v225_v62, %v53_v61 }
  0xce   :  { %v208_v1 = vpop.f32.mrf.mxu0  ;;  %v281_v11 = vld [vmem:[#allocation2 + $0x60] sm:$0xff] }
  0xcf   :  { %263 = vst.msk [vmem:[#allocation2 + $0x68] sm:$0xff] %vm23_vm0, %v246_v0  ;;  %v239_v2 = vadd.f32 %v208_v1, %v46_v63 }
  0xd0   :  { %v274_v4 = vld [vmem:[#allocation2 + $0x28] sm:$0xff] }
  0xd1   :  { %256 = vst.msk [vmem:[#allocation2 + $0x30] sm:$0xff] %vm23_vm0, %v239_v2  ;;  %v287_v5 = vpack.c.bf16 %v274_v4, %v273_v3 }
  0xd3   :  { %494 = vmatmul.msk.bf16.gmra.mxu1 %vm23_vm0, %v287_v5 }
  0xd4   :  { %v228_v7 = vpop.f32.mrf.mxu2 }
  0xd5   :  { %v247_v9 = vadd.f32 %v228_v7, %v54_v6 }
  0xd6   :  { %v210_v10 = vpop.f32.mrf.mxu0  ;;  %v282_v12 = vld [vmem:[#allocation2 + $0x68] sm:$0xff] }
  0xd7   :  { %264 = vst.msk [vmem:[#allocation2 + $0x70] sm:$0xff] %vm23_vm0, %v247_v9  ;;  %v240_v13 = vadd.f32 %v210_v10, %v47_v8  ;;  %v291_v14 = vpack.c.bf16 %v282_v12, %v281_v11 }
  0xd8   :  { %v275_v18 = vld [vmem:[#allocation2 + $0x30] sm:$0xff] }
  0xd9   :  { %257 = vst.msk [vmem:[#allocation2 + $0x38] sm:$0xff] %vm23_vm0, %v240_v13  ;;  %498 = vmatmul.msk.bf16.gmra.mxu3 %vm23_vm0, %v291_v14 }
  0xdc   :  { %v230_v16 = vpop.f32.mrf.mxu2 }
  0xdd   :  { %v248_v17 = vadd.f32 %v230_v16, %v55_v15 }
  0xde   :  { %v283_v21 = vld [vmem:[#allocation2 + $0x70] sm:$0xff] }
  0xdf   :  { %265 = vst.msk [vmem:[#allocation2 + $0x78] sm:$0xff] %vm23_vm0, %v248_v17 }
  0xe0   :  { %v276_v19 = vld [vmem:[#allocation2 + $0x38] sm:$0xff] }
  0xe1   :  { %v288_v20 = vpack.c.bf16 %v276_v19, %v275_v18 }
  0xe3   :  { %495 = vmatmul.msk.bf16.gmra.mxu1 %vm23_vm0, %v288_v20 }
  0xe6   :  { %v284_v22 = vld [vmem:[#allocation2 + $0x78] sm:$0xff] }
  0xe7   :  { %v292_v23 = vpack.c.bf16 %v284_v22, %v283_v21 }
  0xe9   :  { %499 = vmatmul.msk.bf16.gmra.mxu3 %vm23_vm0, %v292_v23 }
  0xf3   :  { %496 = vmatmul.msk.bf16.gmra.mxu1 %vm23_vm0, %v289_v26 }
 0x130   :  { %v346_v28 = vpop.f32.mrf.mxu1 }
 0x131   :  { %v347_v29 = vadd.f32 %v532_v27, %v346_v28 }
 0x133   :  { %386 = vst [vmem:[#allocation3] sm:$0xff] %v347_v29 }
 0x138   :  { %v348_v30 = vpop.f32.mrf.mxu1 }
 0x139   :  { %v349_v31 = vadd.f32 %v532_v27, %v348_v30 }
 0x13b   :  { %387 = vst [vmem:[#allocation3 + $0x8] sm:$0xff] %v349_v31 }
 0x140   :  { %v351_v32 = vpop.f32.mrf.mxu1 }
 0x141   :  { %v352_v33 = vadd.f32 %v532_v27, %v351_v32 }
 0x143   :  { %388 = vst [vmem:[#allocation3 + $0x10] sm:$0xff] %v352_v33 }
 0x148   :  { %v353_v34 = vpop.f32.mrf.mxu1 }
 0x149   :  { %v354_v35 = vadd.f32 %v532_v27, %v353_v34 }
 0x14b   :  { %389 = vst [vmem:[#allocation3 + $0x18] sm:$0xff] %v354_v35 }
 0x14c   :  { %v371_v36 = vpop.f32.mrf.mxu3 }
 0x14d   :  { %v372_v37 = vadd.f32 %v532_v27, %v371_v36 }
 0x14f   :  { %396 = vst [vmem:[#allocation3 + $0x50] sm:$0xff] %v372_v37 }
 0x150   :  { %v356_v38 = vpop.f32.mrf.mxu1 }
 0x151   :  { %v357_v39 = vadd.f32 %v532_v27, %v356_v38 }
 0x153   :  { %390 = vst [vmem:[#allocation3 + $0x20] sm:$0xff] %v357_v39 }
 0x154   :  { %v373_v40 = vpop.f32.mrf.mxu3 }
 0x155   :  { %v374_v41 = vadd.f32 %v532_v27, %v373_v40 }
 0x157   :  { %397 = vst [vmem:[#allocation3 + $0x58] sm:$0xff] %v374_v41 }
 0x158   :  { %v358_v42 = vpop.f32.mrf.mxu1 }
 0x159   :  { %v359_v43 = vadd.f32 %v532_v27, %v358_v42 }
 0x15b   :  { %391 = vst [vmem:[#allocation3 + $0x28] sm:$0xff] %v359_v43 }
 0x15c   :  { %v376_v44 = vpop.f32.mrf.mxu3 }
 0x15d   :  { %v377_v45 = vadd.f32 %v532_v27, %v376_v44 }
 0x15f   :  { %398 = vst [vmem:[#allocation3 + $0x60] sm:$0xff] %v377_v45 }
 0x160   :  { %v361_v46 = vpop.f32.mrf.mxu1 }
 0x161   :  { %v362_v47 = vadd.f32 %v532_v27, %v361_v46 }
 0x163   :  { %392 = vst [vmem:[#allocation3 + $0x30] sm:$0xff] %v362_v47 }
 0x164   :  { %v378_v48 = vpop.f32.mrf.mxu3 }
 0x165   :  { %v379_v49 = vadd.f32 %v532_v27, %v378_v48 }
 0x167   :  { %399 = vst [vmem:[#allocation3 + $0x68] sm:$0xff] %v379_v49 }
 0x168   :  { %v363_v50 = vpop.f32.mrf.mxu1 }
 0x169   :  { %v364_v51 = vadd.f32 %v532_v27, %v363_v50 }
 0x16b   :  { %393 = vst [vmem:[#allocation3 + $0x38] sm:$0xff] %v364_v51 }
 0x16c   :  { %v381_v52 = vpop.f32.mrf.mxu3 }
 0x16d   :  { %v382_v53 = vadd.f32 %v532_v27, %v381_v52 }
 0x16f   :  { %400 = vst [vmem:[#allocation3 + $0x70] sm:$0xff] %v382_v53 }
 0x170   :  { %v366_v54 = vpop.f32.mrf.mxu1 }
 0x171   :  { %v367_v55 = vadd.f32 %v532_v27, %v366_v54 }
 0x173   :  { %394 = vst [vmem:[#allocation3 + $0x40] sm:$0xff] %v367_v55 }
 0x174   :  { %v383_v56 = vpop.f32.mrf.mxu3 }
 0x175   :  { %v384_v57 = vadd.f32 %v532_v27, %v383_v56 }
 0x177   :  { %401 = vst [vmem:[#allocation3 + $0x78] sm:$0xff] %v384_v57 }
 0x178   :  { %v368_v58 = vpop.f32.mrf.mxu1 }
 0x179   :  { %v369_v59 = vadd.f32 %v532_v27, %v368_v58 }
 0x17b   :  { %395 = vst [vmem:[#allocation3 + $0x48] sm:$0xff] %v369_v59 }
 0x17c   :  { %414 = dma.vmem_to_hbm [thread:$0]  %s407_s24, 2048, %s409_s27, [#allocation4], %s561_s28, %s561_s28, %s562_s29  }
 0x17d   :  { %557 = dma.done.wait [#allocation4], 2048  }
 0x17e   :  { %558 = vsyncadd [#allocation4], 4294965248 }
 0x17f   :  { %419 = vsyncpa [#allocation4], 1 }

</bundles_post_ra>
